<compile_context>
chip_gen: v6e
topology: v6e:2x2x1
jax: 0.10.0
libtpu: 0.0.40
codegen_flags: <defaults>
</compile_context>

<pallas_src>
import functools

import jax
import jax.numpy as jnp
from jax import lax
from jax.experimental import pallas as pl
from jax.experimental.pallas import tpu as pltpu


def _round_up(a, b):
    return ((a + b - 1) // b) * b


def _layer_norm(v, g, beta, eps):
    mu = jnp.mean(v, axis=-1, keepdims=True)
    c = v - mu
    var = jnp.mean(c * c, axis=-1, keepdims=True)
    return c * lax.rsqrt(var + eps) * g + beta


# --------------------------- resident-weight kernel --------------------------
def _ffn_resident_kernel(x_ref, w1_ref, b1_ref, w2_ref, b2_ref, g_ref, beta_ref,
                         o_ref, *, eps, identity_map_reordering, f_chunk):
    # Hoist reads once per grid step (JAX does not CSE broadcasts).
    x = x_ref[...].astype(jnp.float32)             # (tile_n, D)
    g = g_ref[...]                                 # (1, D) f32
    beta = beta_ref[...]                           # (1, D) f32
    b2 = b2_ref[...]                               # (1, D) f32

    mxu_dtype = w1_ref.dtype                       # pre-cast in the wrapper
    t = (_layer_norm(x, g, beta, eps) if identity_map_reordering else x)
    t = t.astype(mxu_dtype)

    F = w1_ref.shape[1]
    n_chunks = -(-F // f_chunk)                    # static python int (small:
                                                   # large-F configs use the
                                                   # streamed-weight grid path)
    y = jnp.zeros(o_ref.shape, jnp.float32)        # (tile_n, D) f32 accumulator
    for c in range(n_chunks):
        lo = c * f_chunk
        hi = min(F, lo + f_chunk)
        h = jnp.dot(t, w1_ref[:, lo:hi], preferred_element_type=jnp.float32)
        h = jnp.maximum(h + b1_ref[:, lo:hi], 0.0)          # dropout_2: eval no-op
        y = y + jnp.dot(h.astype(mxu_dtype), w2_ref[lo:hi, :],
                        preferred_element_type=jnp.float32)
    y = y + b2                                               # dropout: eval no-op

    out = x + y if identity_map_reordering else _layer_norm(x + y, g, beta, eps)
    o_ref[...] = out.astype(o_ref.dtype)


# --------------------------- streamed-weight kernel --------------------------
def _ffn_stream_kernel(x_ref, w1_ref, b1_ref, w2_ref, b2_ref, g_ref, beta_ref,
                       o_ref, acc_ref, t_ref, *, eps, identity_map_reordering):
    k = pl.program_id(1)

    @pl.when(k == 0)
    def _init():
        acc_ref[...] = jnp.zeros_like(acc_ref)
        if identity_map_reordering:
            x0 = x_ref[...].astype(jnp.float32)
            t_ref[...] = _layer_norm(x0, g_ref[...], beta_ref[...],
                                     eps).astype(t_ref.dtype)

    mxu_dtype = w1_ref.dtype
    t = t_ref[...] if identity_map_reordering else x_ref[...].astype(mxu_dtype)

    h = jnp.dot(t, w1_ref[...], preferred_element_type=jnp.float32) + b1_ref[...]
    h = jnp.maximum(h, 0.0).astype(mxu_dtype)                # dropout_2: eval no-op
    acc_ref[...] += jnp.dot(h, w2_ref[...], preferred_element_type=jnp.float32)

    @pl.when(k == pl.num_programs(1) - 1)
    def _finalize():
        x = x_ref[...].astype(jnp.float32)
        y = acc_ref[...] + b2_ref[...]                       # dropout: eval no-op
        if identity_map_reordering:
            out = x + y
        else:
            out = _layer_norm(x + y, g_ref[...], beta_ref[...], eps)
        o_ref[...] = out.astype(o_ref.dtype)


# --------------------------------- wrapper -----------------------------------
def layer_feed_forward(x, w1, b1, w2, b2, gamma, beta, *,
                       eps=1e-5, identity_map_reordering=False,
                       tile_n=512, f_chunk=2048, weight_mode="auto",
                       donate_x=False):
    """x: (B, S, d_model); w1: (d_model, d_ff); w2: (d_ff, d_model)."""
    B, S, D = x.shape
    Din, F = w1.shape
    assert Din == D and w2.shape == (F, D)
    N = B * S

    act_dtype = x.dtype
    itemsize = jnp.dtype(act_dtype).itemsize
    mxu_dtype = jnp.bfloat16 if act_dtype == jnp.bfloat16 else jnp.float32
    mxu_itemsize = jnp.dtype(mxu_dtype).itemsize

    # Pre-cast params once (one-time XLA op) instead of per grid step in-kernel.
    w1 = w1.astype(mxu_dtype)
    w2 = w2.astype(mxu_dtype)
    b1 = b1.astype(jnp.float32).reshape(1, F)
    b2 = b2.astype(jnp.float32).reshape(1, D)
    gamma = gamma.astype(jnp.float32).reshape(1, D)
    beta = beta.astype(jnp.float32).reshape(1, D)

    # --- row tiling: full D per block, N tiled; >=2 steps so v7x's 2 TCs share.
    n8 = _round_up(N, 8)
    tn = max(8, min(tile_n, n8))
    if n8 > 256:
        tn = max(128, (tn // 128) * 128)                     # MXU-friendly M dim
        tn = min(tn, _round_up(-(-n8 // 2), 128))            # >= 2 row grid steps
    n_pad = _round_up(n8, tn)
    x2d = x.reshape(N, D)
    if n_pad != N:
        x2d = jnp.pad(x2d, ((0, n_pad - N), (0, 0)))
    n_rows = n_pad // tn

    # --- VMEM budget from the actual chip (v5e/v6e: 128 MiB, v7x: 64 MiB). ----
    try:
        vmem_cap = int(pltpu.get_tpu_info().vmem_capacity_bytes)
    except Exception:
        vmem_cap = 128 << 20
    budget = max(32 << 20, vmem_cap - (16 << 20))
    slack = 2 << 20

    f_chunk_res = min(f_chunk, F)
    resident_bytes = (
        2 * D * F * mxu_itemsize                  # w1 + w2 (single-buffered)
        + (F + 3 * D) * 4                         # b1, b2, gamma, beta (f32)
        + 2 * 2 * tn * D * itemsize               # double-buffered x / out tiles
        + 2 * tn * max(f_chunk_res, D) * 4        # live f32 chunk intermediates
        + slack)

    def _stream_bytes(c):
        return (2 * 2 * D * c * mxu_itemsize      # w1/w2 chunks, double-buffered
                + 2 * c * 4                       # b1 chunk, double-buffered
                + 3 * D * 4                       # b2 / gamma / beta
                + 2 * 2 * tn * D * itemsize       # x / out tiles
                + tn * D * 4                      # f32 accumulator scratch
                + tn * D * mxu_itemsize           # LN(x) scratch
                + 2 * tn * c * 4                  # live f32 fc1 intermediate
                + slack)

    if weight_mode == "auto":
        mode = "resident" if resident_bytes <= budget else "stream"
    else:
        mode = weight_mode

    if mode == "stream":
        f_cap = _round_up(min(f_chunk, F), 128)
        cands = [f_cap] + [c for c in (2048, 1024, 512, 256, 128) if c < f_cap]
        f_chunk_s = next((c for c in cands if _stream_bytes(c) <= budget), 128)
        f_pad = _round_up(F, f_chunk_s)
        if f_pad != F:
            # Zero-padded F columns/rows contribute exactly zero to the output.
            w1 = jnp.pad(w1, ((0, 0), (0, f_pad - F)))
            b1 = jnp.pad(b1, ((0, 0), (0, f_pad - F)))
            w2 = jnp.pad(w2, ((0, f_pad - F), (0, 0)))
        n_k = f_pad // f_chunk_s
        est_bytes = _stream_bytes(f_chunk_s)
    else:
        f_pad = F
        f_chunk_s = f_chunk_res
        n_k = 1
        est_bytes = resident_bytes

    # Never clamp the limit below the computed residency; stay under physical.
    vmem_limit = int(min(max(budget, est_bytes), vmem_cap - (4 << 20)))

    def _const_spec(shape, invariant_mode):
        imap = lambda *_: (0,) * len(shape)
        if invariant_mode is None:
            return pl.BlockSpec(shape, imap)
        # Grid-invariant operands never need a second (prefetch) buffer.
        return pl.BlockSpec(shape, imap, pipeline_mode=invariant_mode)

    def _run(invariant_mode):
        if mode == "resident":
            kernel = functools.partial(
                _ffn_resident_kernel, eps=eps,
                identity_map_reordering=identity_map_reordering,
                f_chunk=f_chunk_res)
            grid = (n_rows,)
            in_specs = [
                pl.BlockSpec((tn, D), lambda i: (i, 0)),      # x tile (streamed)
                _const_spec((D, F), invariant_mode),          # w1 (resident)
                _const_spec((1, F), invariant_mode),          # b1
                _const_spec((F, D), invariant_mode),          # w2 (resident)
                _const_spec((1, D), invariant_mode),          # b2
                _const_spec((1, D), invariant_mode),          # gamma
                _const_spec((1, D), invariant_mode),          # beta
            ]
            out_spec = pl.BlockSpec((tn, D), lambda i: (i, 0))
            scratch = []
            sem = ("parallel",)
        else:
            kernel = functools.partial(
                _ffn_stream_kernel, eps=eps,
                identity_map_reordering=identity_map_reordering)
            grid = (n_rows, n_k)                              # F reduction last
            in_specs = [
                pl.BlockSpec((tn, D), lambda i, k: (i, 0)),   # x (re-used over k)
                pl.BlockSpec((D, f_chunk_s), lambda i, k: (0, k)),   # w1 chunk
                pl.BlockSpec((1, f_chunk_s), lambda i, k: (0, k)),   # b1 chunk
                pl.BlockSpec((f_chunk_s, D), lambda i, k: (k, 0)),   # w2 chunk
                _const_spec((1, D), invariant_mode),          # b2
                _const_spec((1, D), invariant_mode),          # gamma
                _const_spec((1, D), invariant_mode),          # beta
            ]
            out_spec = pl.BlockSpec((tn, D), lambda i, k: (i, 0))
            scratch = [pltpu.VMEM((tn, D), jnp.float32),      # f32 accumulator
                       pltpu.VMEM((tn, D), mxu_dtype)]        # LN(x) cache (imr)
            sem = ("parallel", "arbitrary")

        cost = pl.CostEstimate(
            flops=4 * n_pad * D * f_pad,                      # two matmuls
            transcendentals=n_pad,                            # rsqrt per row
            bytes_accessed=(2 * n_pad * D * itemsize
                            + 2 * D * f_pad * mxu_itemsize))

        io_alias = {0: 0} if donate_x else {}

        return pl.pallas_call(
            kernel,
            out_shape=jax.ShapeDtypeStruct((n_pad, D), act_dtype),
            grid=grid,
            in_specs=in_specs,
            out_specs=out_spec,
            scratch_shapes=scratch,
            compiler_params=pltpu.CompilerParams(
                dimension_semantics=sem,
                vmem_limit_bytes=vmem_limit),
            cost_estimate=cost,
            input_output_aliases=io_alias,
        )(x2d, w1, b1, w2, b2, gamma, beta)

    try:
        out2d = _run(pl.Buffered(1))
    except Exception:
        # Fallback for backends/versions without single-buffer pipeline_mode:
        # default (double-buffered) grid-invariant operands.
        out2d = _run(None)

    if n_pad != N:
        out2d = out2d[:N]
    return out2d.reshape(B, S, D)


# ------------------------------- test helpers --------------------------------
def _reference(x, w1, b1, w2, b2, gamma, beta, *, eps, identity_map_reordering):
    def ln(v):
        mu = jnp.mean(v, axis=-1, keepdims=True)
        var = jnp.mean((v - mu) ** 2, axis=-1, keepdims=True)
        return (v - mu) / jnp.sqrt(var + eps) * gamma + beta

    if identity_map_reordering:
        t = ln(x)
        y = jnp.maximum(t @ w1 + b1, 0.0) @ w2 + b2
        return x + y
    else:
        y = jnp.maximum(x @ w1 + b1, 0.0) @ w2 + b2
        return ln(x + y)


def _make_params(key, D, F):
    kx, k1, kb1, k2, kb2 = jax.random.split(key, 5)
    w1 = jax.random.uniform(k1, (D, F), jnp.float32, -(D ** -0.5), D ** -0.5)
    b1 = jax.random.uniform(kb1, (F,), jnp.float32, -(D ** -0.5), D ** -0.5)
    w2 = jax.random.uniform(k2, (F, D), jnp.float32, -(F ** -0.5), F ** -0.5)
    b2 = jax.random.uniform(kb2, (D,), jnp.float32, -(F ** -0.5), F ** -0.5)
    gamma = jnp.ones((D,), jnp.float32)
    beta = jnp.zeros((D,), jnp.float32)
    return kx, w1, b1, w2, b2, gamma, beta


if __name__ == "__main__":
    eps = 1e-5
    key = jax.random.PRNGKey(0)
    k_small, k_big = jax.random.split(key)

    # --- Toy config matching the module spec (d_model=32, d_ff=64) ---
    B, S, D, F = 2, 8, 32, 64
    kx, w1, b1, w2, b2, gamma, beta = _make_params(k_small, D, F)
    x = jax.random.normal(kx, (B, S, D), dtype=jnp.float32)
    for imr in (False, True):
        out = jax.block_until_ready(layer_feed_forward(
            x, w1, b1, w2, b2, gamma, beta, eps=eps,
            identity_map_reordering=imr))
        ref = _reference(x, w1, b1, w2, b2, gamma, beta,
                         eps=eps, identity_map_reordering=imr)
        assert out.shape == (B, S, D)
        assert jnp.allclose(out, ref, atol=1e-5, rtol=1e-5), f"toy mismatch imr={imr}"

    # --- Multi-tile config: row grid + padding, resident chunked fc1/fc2 AND
    #     the forced streamed-weight (2-D grid) path -------------------------
    B, S, D, F = 2, 72, 128, 256          # N=144 -> padded to 192, row grid=(3,)
    kx, w1, b1, w2, b2, gamma, beta = _make_params(k_big, D, F)
    x = jax.random.normal(kx, (B, S, D), dtype=jnp.float32)
    for imr in (False, True):
        for mode in ("resident", "stream"):
            out = jax.block_until_ready(layer_feed_forward(
                x, w1, b1, w2, b2, gamma, beta, eps=eps,
                identity_map_reordering=imr, tile_n=64,
                f_chunk=128, weight_mode=mode))
            ref = _reference(x, w1, b1, w2, b2, gamma, beta,
                             eps=eps, identity_map_reordering=imr)
            assert out.shape == (B, S, D)
            assert jnp.allclose(out, ref, atol=1e-4, rtol=1e-4), \
                f"mismatch imr={imr} mode={mode}"

    # --- bf16 smoke test (MXU bf16 path): shape / finiteness only ---
    out = jax.block_until_ready(layer_feed_forward(
        x.astype(jnp.bfloat16), w1, b1, w2, b2, gamma, beta, eps=eps))
    assert out.dtype == jnp.bfloat16 and out.shape == (B, S, D)
    assert bool(jnp.all(jnp.isfinite(out.astype(jnp.float32))))

    print("KERNEL_OK")
</pallas_src>

<mosaic_0001>
module attributes {stable_mosaic.version = 11 : i64} {
  func.func @_ffn_resident_kernel(%arg0: i32, %arg1: memref<16x32xf32, #tpu.memory_space<vmem>>, %arg2: memref<32x64xf32, #tpu.memory_space<vmem>>, %arg3: memref<1x64xf32, #tpu.memory_space<vmem>>, %arg4: memref<64x32xf32, #tpu.memory_space<vmem>>, %arg5: memref<1x32xf32, #tpu.memory_space<vmem>>, %arg6: memref<1x32xf32, #tpu.memory_space<vmem>>, %arg7: memref<1x32xf32, #tpu.memory_space<vmem>>, %arg8: memref<16x32xf32, #tpu.memory_space<vmem>>) attributes {dimension_semantics = [#tpu.dimension_semantics<parallel>], iteration_bounds = array<i64: 1>, scalar_prefetch = 0 : i64, scratch_operands = 0 : i64, tpu.core_type = #tpu.core_type<tc>, window_params = [{transform_indices = @transform_0, window_bounds = array<i64: 16, 32>}, {pipeline_mode = #tpu.pipeline_mode<synchronous>, transform_indices = @transform_1, window_bounds = array<i64: 32, 64>}, {pipeline_mode = #tpu.pipeline_mode<synchronous>, transform_indices = @transform_2, window_bounds = array<i64: 1, 64>}, {pipeline_mode = #tpu.pipeline_mode<synchronous>, transform_indices = @transform_3, window_bounds = array<i64: 64, 32>}, {pipeline_mode = #tpu.pipeline_mode<synchronous>, transform_indices = @transform_4, window_bounds = array<i64: 1, 32>}, {pipeline_mode = #tpu.pipeline_mode<synchronous>, transform_indices = @transform_5, window_bounds = array<i64: 1, 32>}, {pipeline_mode = #tpu.pipeline_mode<synchronous>, transform_indices = @transform_6, window_bounds = array<i64: 1, 32>}, {transform_indices = @transform_7, window_bounds = array<i64: 16, 32>}]} {
    %c0 = arith.constant 0 : index
    %c0_0 = arith.constant 0 : index
    %0 = vector.load %arg1[%c0, %c0_0] : memref<16x32xf32, #tpu.memory_space<vmem>>, vector<16x32xf32>
    %c0_1 = arith.constant 0 : index
    %c0_2 = arith.constant 0 : index
    %1 = vector.load %arg6[%c0_1, %c0_2] : memref<1x32xf32, #tpu.memory_space<vmem>>, vector<1x32xf32>
    %c0_3 = arith.constant 0 : index
    %c0_4 = arith.constant 0 : index
    %2 = vector.load %arg7[%c0_3, %c0_4] : memref<1x32xf32, #tpu.memory_space<vmem>>, vector<1x32xf32>
    %c0_5 = arith.constant 0 : index
    %c0_6 = arith.constant 0 : index
    %3 = vector.load %arg5[%c0_5, %c0_6] : memref<1x32xf32, #tpu.memory_space<vmem>>, vector<1x32xf32>
    %cst = arith.constant 0.000000e+00 : f32
    %4 = vector.broadcast %cst : f32 to vector<16x32xf32>
    %c0_7 = arith.constant 0 : index
    %c0_8 = arith.constant 0 : index
    %5 = vector.load %arg2[%c0_7, %c0_8] : memref<32x64xf32, #tpu.memory_space<vmem>>, vector<32x64xf32>
    %cst_9 = arith.constant dense<0.000000e+00> : vector<16x64xf32>
    %6 = tpu.matmul %0, %5, %cst_9 {dimension_numbers = #tpu.dot_dimension_numbers<[1], [0], [0], [1], [0, 0, 1, 1], [], []>} : vector<16x32xf32>, vector<32x64xf32>, vector<16x64xf32> -> vector<16x64xf32>
    %c0_10 = arith.constant 0 : index
    %c0_11 = arith.constant 0 : index
    %7 = vector.load %arg3[%c0_10, %c0_11] : memref<1x64xf32, #tpu.memory_space<vmem>>, vector<1x64xf32>
    %8 = vector.broadcast %7 : vector<1x64xf32> to vector<16x64xf32>
    %9 = arith.addf %6, %8 : vector<16x64xf32>
    %cst_12 = arith.constant 0.000000e+00 : f32
    %10 = vector.broadcast %cst_12 : f32 to vector<16x64xf32>
    %11 = arith.maximumf %9, %10 : vector<16x64xf32>
    %c0_13 = arith.constant 0 : index
    %c0_14 = arith.constant 0 : index
    %12 = vector.load %arg4[%c0_13, %c0_14] : memref<64x32xf32, #tpu.memory_space<vmem>>, vector<64x32xf32>
    %cst_15 = arith.constant dense<0.000000e+00> : vector<16x32xf32>
    %13 = tpu.matmul %11, %12, %cst_15 {dimension_numbers = #tpu.dot_dimension_numbers<[1], [0], [0], [1], [0, 0, 1, 1], [], []>} : vector<16x64xf32>, vector<64x32xf32>, vector<16x32xf32> -> vector<16x32xf32>
    %14 = arith.addf %4, %13 : vector<16x32xf32>
    %15 = vector.broadcast %3 : vector<1x32xf32> to vector<16x32xf32>
    %16 = arith.addf %14, %15 : vector<16x32xf32>
    %17 = arith.addf %0, %16 : vector<16x32xf32>
    %cst_16 = arith.constant dense<0.000000e+00> : vector<16xf32>
    %18 = vector.multi_reduction <add>, %17, %cst_16 [1] : vector<16x32xf32> to vector<16xf32>
    %19 = vector.shape_cast %18 : vector<16xf32> to vector<16x1xf32>
    %cst_17 = arith.constant 3.200000e+01 : f32
    %20 = vector.broadcast %cst_17 : f32 to vector<16x1xf32>
    %21 = arith.divf %19, %20 : vector<16x1xf32>
    %22 = vector.broadcast %21 : vector<16x1xf32> to vector<16x32xf32>
    %23 = arith.subf %17, %22 : vector<16x32xf32>
    %24 = arith.mulf %23, %23 : vector<16x32xf32>
    %cst_18 = arith.constant dense<0.000000e+00> : vector<16xf32>
    %25 = vector.multi_reduction <add>, %24, %cst_18 [1] : vector<16x32xf32> to vector<16xf32>
    %26 = vector.shape_cast %25 : vector<16xf32> to vector<16x1xf32>
    %cst_19 = arith.constant 3.200000e+01 : f32
    %27 = vector.broadcast %cst_19 : f32 to vector<16x1xf32>
    %28 = arith.divf %26, %27 : vector<16x1xf32>
    %cst_20 = arith.constant 9.99999974E-6 : f32
    %29 = vector.broadcast %cst_20 : f32 to vector<16x1xf32>
    %30 = arith.addf %28, %29 : vector<16x1xf32>
    %31 = math.rsqrt %30 : vector<16x1xf32>
    %32 = vector.broadcast %31 : vector<16x1xf32> to vector<16x32xf32>
    %33 = arith.mulf %23, %32 : vector<16x32xf32>
    %34 = vector.broadcast %1 : vector<1x32xf32> to vector<16x32xf32>
    %35 = arith.mulf %33, %34 : vector<16x32xf32>
    %36 = vector.broadcast %2 : vector<1x32xf32> to vector<16x32xf32>
    %37 = arith.addf %35, %36 : vector<16x32xf32>
    %c0_21 = arith.constant 0 : index
    %c0_22 = arith.constant 0 : index
    %38 = vector.load %arg8[%c0_21, %c0_22] : memref<16x32xf32, #tpu.memory_space<vmem>>, vector<16x32xf32>
    tpu.vector_store %arg8[%c0_21, %c0_22], %37 {strides = array<i32>} : memref<16x32xf32, #tpu.memory_space<vmem>>, vector<16x32xf32>,
    return
  }
  func.func @transform_0(%arg0: i32) -> (i32, i32) {
    %c0_i32 = arith.constant 0 : i32
    %c0_i32_0 = arith.constant 0 : i32
    return %arg0, %c0_i32 : i32, i32
  }
  func.func @transform_1(%arg0: i32) -> (i32, i32) {
    %c0_i32 = arith.constant 0 : i32
    %c0_i32_0 = arith.constant 0 : i32
    %c0_i32_1 = arith.constant 0 : i32
    return %c0_i32, %c0_i32_0 : i32, i32
  }
  func.func @transform_2(%arg0: i32) -> (i32, i32) {
    %c0_i32 = arith.constant 0 : i32
    %c0_i32_0 = arith.constant 0 : i32
    %c0_i32_1 = arith.constant 0 : i32
    return %c0_i32, %c0_i32_0 : i32, i32
  }
  func.func @transform_3(%arg0: i32) -> (i32, i32) {
    %c0_i32 = arith.constant 0 : i32
    %c0_i32_0 = arith.constant 0 : i32
    %c0_i32_1 = arith.constant 0 : i32
    return %c0_i32, %c0_i32_0 : i32, i32
  }
  func.func @transform_4(%arg0: i32) -> (i32, i32) {
    %c0_i32 = arith.constant 0 : i32
    %c0_i32_0 = arith.constant 0 : i32
    %c0_i32_1 = arith.constant 0 : i32
    return %c0_i32, %c0_i32_0 : i32, i32
  }
  func.func @transform_5(%arg0: i32) -> (i32, i32) {
    %c0_i32 = arith.constant 0 : i32
    %c0_i32_0 = arith.constant 0 : i32
    %c0_i32_1 = arith.constant 0 : i32
    return %c0_i32, %c0_i32_0 : i32, i32
  }
  func.func @transform_6(%arg0: i32) -> (i32, i32) {
    %c0_i32 = arith.constant 0 : i32
    %c0_i32_0 = arith.constant 0 : i32
    %c0_i32_1 = arith.constant 0 : i32
    return %c0_i32, %c0_i32_0 : i32, i32
  }
  func.func @transform_7(%arg0: i32) -> (i32, i32) {
    %c0_i32 = arith.constant 0 : i32
    %c0_i32_0 = arith.constant 0 : i32
    return %arg0, %c0_i32 : i32, i32
  }
}

module attributes {stable_mosaic.version = 11 : i64} {
  func.func @_ffn_resident_kernel(%arg0: i32, %arg1: memref<16x32xf32, #tpu.memory_space<vmem>>, %arg2: memref<32x64xf32, #tpu.memory_space<vmem>>, %arg3: memref<1x64xf32, #tpu.memory_space<vmem>>, %arg4: memref<64x32xf32, #tpu.memory_space<vmem>>, %arg5: memref<1x32xf32, #tpu.memory_space<vmem>>, %arg6: memref<1x32xf32, #tpu.memory_space<vmem>>, %arg7: memref<1x32xf32, #tpu.memory_space<vmem>>, %arg8: memref<16x32xf32, #tpu.memory_space<vmem>>) attributes {dimension_semantics = [#tpu.dimension_semantics<parallel>], iteration_bounds = array<i64: 1>, scalar_prefetch = 0 : i64, scratch_operands = 0 : i64, tpu.core_type = #tpu.core_type<tc>, window_params = [{transform_indices = @transform_0, window_bounds = array<i64: 16, 32>}, {pipeline_mode = #tpu.pipeline_mode<synchronous>, transform_indices = @transform_1, window_bounds = array<i64: 32, 64>}, {pipeline_mode = #tpu.pipeline_mode<synchronous>, transform_indices = @transform_2, window_bounds = array<i64: 1, 64>}, {pipeline_mode = #tpu.pipeline_mode<synchronous>, transform_indices = @transform_3, window_bounds = array<i64: 64, 32>}, {pipeline_mode = #tpu.pipeline_mode<synchronous>, transform_indices = @transform_4, window_bounds = array<i64: 1, 32>}, {pipeline_mode = #tpu.pipeline_mode<synchronous>, transform_indices = @transform_5, window_bounds = array<i64: 1, 32>}, {pipeline_mode = #tpu.pipeline_mode<synchronous>, transform_indices = @transform_6, window_bounds = array<i64: 1, 32>}, {transform_indices = @transform_7, window_bounds = array<i64: 16, 32>}]} {
    %c0 = arith.constant 0 : index
    %c0_0 = arith.constant 0 : index
    %0 = vector.load %arg1[%c0, %c0_0] : memref<16x32xf32, #tpu.memory_space<vmem>>, vector<16x32xf32>
    %c0_1 = arith.constant 0 : index
    %c0_2 = arith.constant 0 : index
    %1 = vector.load %arg6[%c0_1, %c0_2] : memref<1x32xf32, #tpu.memory_space<vmem>>, vector<1x32xf32>
    %c0_3 = arith.constant 0 : index
    %c0_4 = arith.constant 0 : index
    %2 = vector.load %arg7[%c0_3, %c0_4] : memref<1x32xf32, #tpu.memory_space<vmem>>, vector<1x32xf32>
    %c0_5 = arith.constant 0 : index
    %c0_6 = arith.constant 0 : index
    %3 = vector.load %arg5[%c0_5, %c0_6] : memref<1x32xf32, #tpu.memory_space<vmem>>, vector<1x32xf32>
    %cst = arith.constant 0.000000e+00 : f32
    %4 = vector.broadcast %cst : f32 to vector<16x32xf32>
    %c0_7 = arith.constant 0 : index
    %c0_8 = arith.constant 0 : index
    %5 = vector.load %arg2[%c0_7, %c0_8] : memref<32x64xf32, #tpu.memory_space<vmem>>, vector<32x64xf32>
    %cst_9 = arith.constant dense<0.000000e+00> : vector<16x64xf32>
    %6 = tpu.matmul %0, %5, %cst_9 {dimension_numbers = #tpu.dot_dimension_numbers<[1], [0], [0], [1], [0, 0, 1, 1], [], []>} : vector<16x32xf32>, vector<32x64xf32>, vector<16x64xf32> -> vector<16x64xf32>
    %c0_10 = arith.constant 0 : index
    %c0_11 = arith.constant 0 : index
    %7 = vector.load %arg3[%c0_10, %c0_11] : memref<1x64xf32, #tpu.memory_space<vmem>>, vector<1x64xf32>
    %8 = vector.broadcast %7 : vector<1x64xf32> to vector<16x64xf32>
    %9 = arith.addf %6, %8 : vector<16x64xf32>
    %cst_12 = arith.constant 0.000000e+00 : f32
    %10 = vector.broadcast %cst_12 : f32 to vector<16x64xf32>
    %11 = arith.maximumf %9, %10 : vector<16x64xf32>
    %c0_13 = arith.constant 0 : index
    %c0_14 = arith.constant 0 : index
    %12 = vector.load %arg4[%c0_13, %c0_14] : memref<64x32xf32, #tpu.memory_space<vmem>>, vector<64x32xf32>
    %cst_15 = arith.constant dense<0.000000e+00> : vector<16x32xf32>
    %13 = tpu.matmul %11, %12, %cst_15 {dimension_numbers = #tpu.dot_dimension_numbers<[1], [0], [0], [1], [0, 0, 1, 1], [], []>} : vector<16x64xf32>, vector<64x32xf32>, vector<16x32xf32> -> vector<16x32xf32>
    %14 = arith.addf %4, %13 : vector<16x32xf32>
    %15 = vector.broadcast %3 : vector<1x32xf32> to vector<16x32xf32>
    %16 = arith.addf %14, %15 : vector<16x32xf32>
    %17 = arith.addf %0, %16 : vector<16x32xf32>
    %cst_16 = arith.constant dense<0.000000e+00> : vector<16xf32>
    %18 = vector.multi_reduction <add>, %17, %cst_16 [1] : vector<16x32xf32> to vector<16xf32>
    %19 = vector.shape_cast %18 : vector<16xf32> to vector<16x1xf32>
    %cst_17 = arith.constant 3.200000e+01 : f32
    %20 = vector.broadcast %cst_17 : f32 to vector<16x1xf32>
    %21 = arith.divf %19, %20 : vector<16x1xf32>
    %22 = vector.broadcast %21 : vector<16x1xf32> to vector<16x32xf32>
    %23 = arith.subf %17, %22 : vector<16x32xf32>
    %24 = arith.mulf %23, %23 : vector<16x32xf32>
    %cst_18 = arith.constant dense<0.000000e+00> : vector<16xf32>
    %25 = vector.multi_reduction <add>, %24, %cst_18 [1] : vector<16x32xf32> to vector<16xf32>
    %26 = vector.shape_cast %25 : vector<16xf32> to vector<16x1xf32>
    %cst_19 = arith.constant 3.200000e+01 : f32
    %27 = vector.broadcast %cst_19 : f32 to vector<16x1xf32>
    %28 = arith.divf %26, %27 : vector<16x1xf32>
    %cst_20 = arith.constant 9.99999974E-6 : f32
    %29 = vector.broadcast %cst_20 : f32 to vector<16x1xf32>
    %30 = arith.addf %28, %29 : vector<16x1xf32>
    %31 = math.rsqrt %30 : vector<16x1xf32>
    %32 = vector.broadcast %31 : vector<16x1xf32> to vector<16x32xf32>
    %33 = arith.mulf %23, %32 : vector<16x32xf32>
    %34 = vector.broadcast %1 : vector<1x32xf32> to vector<16x32xf32>
    %35 = arith.mulf %33, %34 : vector<16x32xf32>
    %36 = vector.broadcast %2 : vector<1x32xf32> to vector<16x32xf32>
    %37 = arith.addf %35, %36 : vector<16x32xf32>
    %c0_21 = arith.constant 0 : index
    %c0_22 = arith.constant 0 : index
    %38 = vector.load %arg8[%c0_21, %c0_22] : memref<16x32xf32, #tpu.memory_space<vmem>>, vector<16x32xf32>
    tpu.vector_store %arg8[%c0_21, %c0_22], %37 {strides = array<i32>} : memref<16x32xf32, #tpu.memory_space<vmem>>, vector<16x32xf32>,
    return
  }
  func.func @transform_0(%arg0: i32) -> (i32, i32) {
    %c0_i32 = arith.constant 0 : i32
    %c0_i32_0 = arith.constant 0 : i32
    return %arg0, %c0_i32 : i32, i32
  }
  func.func @transform_1(%arg0: i32) -> (i32, i32) {
    %c0_i32 = arith.constant 0 : i32
    %c0_i32_0 = arith.constant 0 : i32
    %c0_i32_1 = arith.constant 0 : i32
    return %c0_i32, %c0_i32_0 : i32, i32
  }
  func.func @transform_2(%arg0: i32) -> (i32, i32) {
    %c0_i32 = arith.constant 0 : i32
    %c0_i32_0 = arith.constant 0 : i32
    %c0_i32_1 = arith.constant 0 : i32
    return %c0_i32, %c0_i32_0 : i32, i32
  }
  func.func @transform_3(%arg0: i32) -> (i32, i32) {
    %c0_i32 = arith.constant 0 : i32
    %c0_i32_0 = arith.constant 0 : i32
    %c0_i32_1 = arith.constant 0 : i32
    return %c0_i32, %c0_i32_0 : i32, i32
  }
  func.func @transform_4(%arg0: i32) -> (i32, i32) {
    %c0_i32 = arith.constant 0 : i32
    %c0_i32_0 = arith.constant 0 : i32
    %c0_i32_1 = arith.constant 0 : i32
    return %c0_i32, %c0_i32_0 : i32, i32
  }
  func.func @transform_5(%arg0: i32) -> (i32, i32) {
    %c0_i32 = arith.constant 0 : i32
    %c0_i32_0 = arith.constant 0 : i32
    %c0_i32_1 = arith.constant 0 : i32
    return %c0_i32, %c0_i32_0 : i32, i32
  }
  func.func @transform_6(%arg0: i32) -> (i32, i32) {
    %c0_i32 = arith.constant 0 : i32
    %c0_i32_0 = arith.constant 0 : i32
    %c0_i32_1 = arith.constant 0 : i32
    return %c0_i32, %c0_i32_0 : i32, i32
  }
  func.func @transform_7(%arg0: i32) -> (i32, i32) {
    %c0_i32 = arith.constant 0 : i32
    %c0_i32_0 = arith.constant 0 : i32
    return %arg0, %c0_i32 : i32, i32
  }
}

</mosaic_0001>

<bundles_post_ra>
// kernel: tpu_custom_call.1
= control target key start
LH: loop header
LB: loop body
LE: loop exit
PB: predicated region body
PF: predicated region fallthrough
CT: control target
= control target key end

     0   :  { %vm43_vm0 = vcmask 261120   ;;  %s477_s0 = inlined_call_operand.vmem [shape: f32[16,32], index: 0, kind: input, shape index: {}]   ;;  %s478_s1 = inlined_call_operand.vmem [shape: f32[32,64], index: 1, kind: input, shape index: {}]   ;;  %s479_s2 = inlined_call_operand.vmem [shape: f32[1,64], index: 2, kind: input, shape index: {}]   ;;  %s480_s3 = inlined_call_operand.vmem [shape: f32[64,32], index: 3, kind: input, shape index: {}]   ;;  %s481_s4 = inlined_call_operand.vmem [shape: f32[1,32], index: 4, kind: input, shape index: {}]   ;;  %s482_s5 = inlined_call_operand.vmem [shape: f32[1,32], index: 5, kind: input, shape index: {}]   ;;  %s483_s6 = inlined_call_operand.vmem [shape: f32[1,32], index: 6, kind: input, shape index: {}]   ;;  %s484_s7 = inlined_call_operand.hbm [shape: f32[16,32], index: 7, kind: output, shape index: {}]  }
   0x1   :  { %v35_v0 = vld [vmem:[%s478_s1 + $0x18] sm:$0xff]  ;;  %v34_v1 = vld [vmem:[%s478_s1 + $0x10] sm:$0xff]  ;;  %v27_v2 = vld [vmem:[%s477_s0] sm:$0xff] }
   0x2   :  { %310 = vmatprep.subr.mxu0 %v35_v0  ;;  %v33_v3 = vld [vmem:[%s478_s1 + $0x8] sm:$0xff]  ;;  %318 = vmatprep.mubr.msk.f32.mxu0 %vm43_vm0, %v27_v2  ;;  %v134_v4 = vld [vmem:[%s480_s3 + $0x38] sm:$0xff]  ;;  %v133_v5 = vld [vmem:[%s480_s3 + $0x30] sm:$0xff] }
   0x3   :  { %311 = vmatpush3.msra.mxu0 %v35_v0  ;;  %321 = vmatprep.subr.mxu1 %v134_v4 }
   0x4   :  { %312 = vmatprep.subr.mxu0 %v34_v1 }
   0x5   :  { %12 = vsyncpa [#allocation3], 0  ;;  %313 = vmatpush3.msra.mxu0 %v34_v1  ;;  %v32_v6 = vld [vmem:[%s478_s1] sm:$0xff]  ;;  %322 = vmatpush3.msra.mxu1 %v134_v4  ;;  %v132_v7 = vld [vmem:[%s480_s3 + $0x28] sm:$0xff]  ;;  %vm141_vm1 = vcmask 523264   ;;  %s369_s9 = smov [#allocation2]  }
   0x6   :  { %314 = vmatprep.subr.mxu0 %v33_v3  ;;  %323 = vmatprep.subr.mxu1 %v133_v5  ;;  %v28_v8 = vld [vmem:[%s477_s0 + $0x8] sm:$0xff]  ;;  %v131_v9 = vld [vmem:[%s480_s3 + $0x20] sm:$0xff]  ;;  %v130_v10 = vld [vmem:[%s480_s3 + $0x18] sm:$0xff]  ;;  %s275_s10 = sshll.u32 %s369_s9, 4  ;;  %s276_s10 = int_to_ptr.vmem [resolvable:$true] %s275_s10 }
   0x7   :  { %315 = vmatpush3.msra.mxu0 %v33_v3  ;;  %324 = vmatpush3.msra.mxu1 %v133_v5  ;;  %v129_v11 = vld [vmem:[%s480_s3 + $0x10] sm:$0xff]  ;;  %v128_v12 = vld [vmem:[%s480_s3 + $0x8] sm:$0xff]  ;;  %v127_v13 = vld [vmem:[%s480_s3] sm:$0xff]  ;;  %s347_s11 = scalar_lea.vmem %s276_s10, 256  ;;  %p352_p1 = scmp.lt.s32.totalorder %s276_s10, %s276_s10 }
   0x8   :  { %316 = vmatprep.subr.mxu0 %v32_v6  ;;  %325 = vmatprep.subr.mxu1 %v132_v7  ;;  %v286_v14 = vld [vmem:[%s479_s2] ss:$0 sm:$0xff]  ;;  %p348_p0 = scmp.ne.s32.totalorder %s276_s10, %s347_s11  ;;  %p353_p2 = scmp.lt.s32.totalorder %s347_s11, %s347_s11 }
   0x9   :  { %317 = vmatpush3.msra.mxu0 %v32_v6  ;;  %326 = vmatpush3.msra.mxu1 %v132_v7  ;;  %v289_v22 = vld [vmem:[%s481_s4] ss:$0 sm:$0xff] }
   0xa   :  { %319 = vmatmul.mubr.msk.f32.vlgmr.msra.gmra.mxu0 %vm43_vm0, %v28_v8  ;;  %327 = vmatprep.subr.mxu1 %v131_v9  ;;  %v292_v47 = vld [vmem:[%s482_s5] ss:$0 sm:$0xff]  ;;  %p354_p3 = por %p353_p2, %p352_p1 }
   0xb   :  { %328 = vmatpush3.msra.mxu1 %v131_v9  ;;  %v293_v49 = vld [vmem:[%s483_s6] ss:$0 sm:$0xff] }
   0xc   :  { %329 = vmatprep.subr.mxu1 %v130_v10  ;;  %p355_p4 = pnand %p354_p3, %p348_p0 }
   0xd   :  { %330 = vmatpush3.msra.mxu1 %v130_v10 }
   0xe   :  { %331 = vmatprep.subr.mxu1 %v129_v11 }
   0xf   :  { %332 = vmatpush3.msra.mxu1 %v129_v11 }
  0x10   :  { %333 = vmatprep.subr.mxu1 %v128_v12 }
  0x11   :  { %334 = vmatpush3.msra.mxu1 %v128_v12 }
  0x12   :  { %335 = vmatprep.subr.mxu1 %v127_v13 }
  0x13   :  { %336 = vmatpush3.msra.mxu1 %v127_v13 }
  0xca   :  { %v320_v15 = vpop.f32.mrf.mxu0 }
  0xcb   :  { %v122_v16 = vadd.f32 %v320_v15, %v286_v14 }
  0xcc   :  { %v116_v17 = vpop.f32.mrf.mxu0 }
  0xcd   :  { %v117_v18 = vadd.f32 %v286_v14, %v116_v17  ;;  %v126_v20 = vmax.f32 %v122_v16, 0.0 }
  0xcf   :  { %v125_v19 = vmax.f32 %v117_v18, 0.0 }
  0xd1   :  { %337 = vmatprep.mubr.msk.f32.mxu1 %vm141_vm1, %v125_v19 }
  0xd2   :  { %338 = vmatmul.mubr.msk.f32.vlgmr.msra.gmra.mxu1 %vm141_vm1, %v126_v20 }
 0x192   :  { %v339_v21 = vpop.f32.mrf.mxu1 }
 0x193   :  { %v220_v24 = vadd.f32 %v339_v21, %v289_v22 }
 0x194   :  { %v214_v23 = vpop.f32.mrf.mxu1 }
 0x195   :  { %v215_v25 = vadd.f32 %v289_v22, %v214_v23  ;;  %v224_v28 = vadd.f32 %v220_v24, %v28_v8 }
 0x197   :  { %v223_v26 = vadd.f32 %v215_v25, %v27_v2  ;;  %v228_v29 = vsel %vm43_vm0, %v224_v28, 0.0 }
 0x199   :  { %v225_v27 = vsel %vm43_vm0, %v223_v26, 0.0 }
 0x19a   :  { %226 = vadd.xlane.f32.xlu0 %v225_v27 }
 0x19e   :  { %229 = vadd.xlane.f32.xlu0 %v228_v29 }
 0x223   :  { %v227_v30 = vpop.xlane.xlu0 %226 }
 0x224   :  { %v232_v31 = vmul.f32 0.03125, %v227_v30 }
 0x226   :  { %v234_v32 = vsub.f32 %v223_v26, %v232_v31 }
 0x227   :  { %v230_v33 = vpop.xlane.xlu0 %229 }
 0x228   :  { %v233_v34 = vmul.f32 0.03125, %v230_v33  ;;  %v236_v35 = vmul.f32 %v234_v32, %v234_v32 }
 0x22a   :  { %v235_v36 = vsub.f32 %v224_v28, %v233_v34  ;;  %v238_v37 = vsel %vm43_vm0, %v236_v35, 0.0 }
 0x22b   :  { %239 = vadd.xlane.f32.xlu1 %v238_v37 }
 0x22c   :  { %v237_v38 = vmul.f32 %v235_v36, %v235_v36 }
 0x22e   :  { %v241_v39 = vsel %vm43_vm0, %v237_v38, 0.0 }
 0x22f   :  { %242 = vadd.xlane.f32.xlu1 %v241_v39 }
 0x2b4   :  { %v240_v40 = vpop.xlane.xlu1 %239 }
 0x2b5   :  { %v244_v41 = vmul.f32 0.03125, %v240_v40 }
 0x2b7   :  { %v246_v42 = vadd.f32 1e-05, %v244_v41 }
 0x2b8   :  { %v243_v43 = vpop.xlane.xlu1 %242 }
 0x2b9   :  { %343 = vrsqrt.f32 %v246_v42  ;;  %v245_v44 = vmul.f32 0.03125, %v243_v43 }
 0x2bb   :  { %v247_v45 = vadd.f32 1e-05, %v245_v44 }
 0x2bd   :  { %345 = vrsqrt.f32 %v247_v45 }
 0x2c6   :  { %v344_v46 = vpop.eup %343 }
 0x2c7   :  { %v250_v48 = vmul.f32 %v344_v46, %v234_v32 }
 0x2c9   :  { %v258_v50 = vmul.f32 %v292_v47, %v250_v48 }
 0x2ca   :  { %v346_v51 = vpop.eup %345 }
 0x2cb   :  { %v251_v52 = vmul.f32 %v346_v51, %v235_v36  ;;  %v266_v53 = vadd.f32 %v293_v49, %v258_v50 }
 0x2cd   :  { %v259_v54 = vmul.f32 %v292_v47, %v251_v52  ;;  %268 = vst.msk [vmem:[#allocation2] sm:$0xff] %vm43_vm0, %v266_v53 }
 0x2cf   :  { %v267_v55 = vadd.f32 %v293_v49, %v259_v54 }
 0x2d1   :  { %269 = vst.msk [vmem:[#allocation2 + $0x8] sm:$0xff] %vm43_vm0, %v267_v55 }
 0x2d2   :  { %358 = shalt.err (!%p355_p4)
}
 0x2d3   :  { %s370_s5 = smov 128   ;;  %s371_s6 = smov 8  }
 0x2d4   :  { %281 = dma.vmem_to_hbm [thread:$0]  %s276_s10, 256, %s484_s7, [#allocation3], %s370_s5, %s370_s5, %s371_s6  }
 0x2d5   :  { %367 = dma.done.wait [#allocation3], 256  }
 0x2d6   :  { %368 = vsyncadd [#allocation3], 4294967040 }
 0x2d7   :  { %285 = vsyncpa [#allocation3], 1 }

// kernel: tpu_custom_call.1
= control target key start
LH: loop header
LB: loop body
LE: loop exit
PB: predicated region body
PF: predicated region fallthrough
CT: control target
= control target key end

     0   :  { %vm43_vm0 = vcmask 261120   ;;  %s477_s0 = inlined_call_operand.vmem [shape: f32[16,32], index: 0, kind: input, shape index: {}]   ;;  %s478_s1 = inlined_call_operand.vmem [shape: f32[32,64], index: 1, kind: input, shape index: {}]   ;;  %s479_s2 = inlined_call_operand.vmem [shape: f32[1,64], index: 2, kind: input, shape index: {}]   ;;  %s480_s3 = inlined_call_operand.vmem [shape: f32[64,32], index: 3, kind: input, shape index: {}]   ;;  %s481_s4 = inlined_call_operand.vmem [shape: f32[1,32], index: 4, kind: input, shape index: {}]   ;;  %s482_s5 = inlined_call_operand.vmem [shape: f32[1,32], index: 5, kind: input, shape index: {}]   ;;  %s483_s6 = inlined_call_operand.vmem [shape: f32[1,32], index: 6, kind: input, shape index: {}]   ;;  %s484_s7 = inlined_call_operand.hbm [shape: f32[16,32], index: 7, kind: output, shape index: {}]  }
   0x1   :  { %v35_v0 = vld [vmem:[%s478_s1 + $0x18] sm:$0xff]  ;;  %v34_v1 = vld [vmem:[%s478_s1 + $0x10] sm:$0xff]  ;;  %v27_v2 = vld [vmem:[%s477_s0] sm:$0xff] }
   0x2   :  { %310 = vmatprep.subr.mxu0 %v35_v0  ;;  %v33_v3 = vld [vmem:[%s478_s1 + $0x8] sm:$0xff]  ;;  %318 = vmatprep.mubr.msk.f32.mxu0 %vm43_vm0, %v27_v2  ;;  %v134_v4 = vld [vmem:[%s480_s3 + $0x38] sm:$0xff]  ;;  %v133_v5 = vld [vmem:[%s480_s3 + $0x30] sm:$0xff] }
   0x3   :  { %311 = vmatpush3.msra.mxu0 %v35_v0  ;;  %321 = vmatprep.subr.mxu1 %v134_v4 }
   0x4   :  { %312 = vmatprep.subr.mxu0 %v34_v1 }
   0x5   :  { %12 = vsyncpa [#allocation3], 0  ;;  %313 = vmatpush3.msra.mxu0 %v34_v1  ;;  %v32_v6 = vld [vmem:[%s478_s1] sm:$0xff]  ;;  %322 = vmatpush3.msra.mxu1 %v134_v4  ;;  %v132_v7 = vld [vmem:[%s480_s3 + $0x28] sm:$0xff]  ;;  %vm141_vm1 = vcmask 523264   ;;  %s369_s9 = smov [#allocation2]  }
   0x6   :  { %314 = vmatprep.subr.mxu0 %v33_v3  ;;  %323 = vmatprep.subr.mxu1 %v133_v5  ;;  %v28_v8 = vld [vmem:[%s477_s0 + $0x8] sm:$0xff]  ;;  %v131_v9 = vld [vmem:[%s480_s3 + $0x20] sm:$0xff]  ;;  %v130_v10 = vld [vmem:[%s480_s3 + $0x18] sm:$0xff]  ;;  %s275_s10 = sshll.u32 %s369_s9, 4  ;;  %s276_s10 = int_to_ptr.vmem [resolvable:$true] %s275_s10 }
   0x7   :  { %315 = vmatpush3.msra.mxu0 %v33_v3  ;;  %324 = vmatpush3.msra.mxu1 %v133_v5  ;;  %v129_v11 = vld [vmem:[%s480_s3 + $0x10] sm:$0xff]  ;;  %v128_v12 = vld [vmem:[%s480_s3 + $0x8] sm:$0xff]  ;;  %v127_v13 = vld [vmem:[%s480_s3] sm:$0xff]  ;;  %s347_s11 = scalar_lea.vmem %s276_s10, 256  ;;  %p352_p1 = scmp.lt.s32.totalorder %s276_s10, %s276_s10 }
   0x8   :  { %316 = vmatprep.subr.mxu0 %v32_v6  ;;  %325 = vmatprep.subr.mxu1 %v132_v7  ;;  %v286_v14 = vld [vmem:[%s479_s2] ss:$0 sm:$0xff]  ;;  %p348_p0 = scmp.ne.s32.totalorder %s276_s10, %s347_s11  ;;  %p353_p2 = scmp.lt.s32.totalorder %s347_s11, %s347_s11 }
   0x9   :  { %317 = vmatpush3.msra.mxu0 %v32_v6  ;;  %326 = vmatpush3.msra.mxu1 %v132_v7  ;;  %v289_v22 = vld [vmem:[%s481_s4] ss:$0 sm:$0xff] }
   0xa   :  { %319 = vmatmul.mubr.msk.f32.vlgmr.msra.gmra.mxu0 %vm43_vm0, %v28_v8  ;;  %327 = vmatprep.subr.mxu1 %v131_v9  ;;  %v292_v47 = vld [vmem:[%s482_s5] ss:$0 sm:$0xff]  ;;  %p354_p3 = por %p353_p2, %p352_p1 }
   0xb   :  { %328 = vmatpush3.msra.mxu1 %v131_v9  ;;  %v293_v49 = vld [vmem:[%s483_s6] ss:$0 sm:$0xff] }
   0xc   :  { %329 = vmatprep.subr.mxu1 %v130_v10  ;;  %p355_p4 = pnand %p354_p3, %p348_p0 }
   0xd   :  { %330 = vmatpush3.msra.mxu1 %v130_v10 }
   0xe   :  { %331 = vmatprep.subr.mxu1 %v129_v11 }
   0xf   :  { %332 = vmatpush3.msra.mxu1 %v129_v11 }
  0x10   :  { %333 = vmatprep.subr.mxu1 %v128_v12 }
  0x11   :  { %334 = vmatpush3.msra.mxu1 %v128_v12 }
  0x12   :  { %335 = vmatprep.subr.mxu1 %v127_v13 }
  0x13   :  { %336 = vmatpush3.msra.mxu1 %v127_v13 }
  0xca   :  { %v320_v15 = vpop.f32.mrf.mxu0 }
  0xcb   :  { %v122_v16 = vadd.f32 %v320_v15, %v286_v14 }
  0xcc   :  { %v116_v17 = vpop.f32.mrf.mxu0 }
  0xcd   :  { %v117_v18 = vadd.f32 %v286_v14, %v116_v17  ;;  %v126_v20 = vmax.f32 %v122_v16, 0.0 }
  0xcf   :  { %v125_v19 = vmax.f32 %v117_v18, 0.0 }
  0xd1   :  { %337 = vmatprep.mubr.msk.f32.mxu1 %vm141_vm1, %v125_v19 }
  0xd2   :  { %338 = vmatmul.mubr.msk.f32.vlgmr.msra.gmra.mxu1 %vm141_vm1, %v126_v20 }
 0x192   :  { %v339_v21 = vpop.f32.mrf.mxu1 }
 0x193   :  { %v220_v24 = vadd.f32 %v339_v21, %v289_v22 }
 0x194   :  { %v214_v23 = vpop.f32.mrf.mxu1 }
 0x195   :  { %v215_v25 = vadd.f32 %v289_v22, %v214_v23  ;;  %v224_v28 = vadd.f32 %v220_v24, %v28_v8 }
 0x197   :  { %v223_v26 = vadd.f32 %v215_v25, %v27_v2  ;;  %v228_v29 = vsel %vm43_vm0, %v224_v28, 0.0 }
 0x199   :  { %v225_v27 = vsel %vm43_vm0, %v223_v26, 0.0 }
 0x19a   :  { %226 = vadd.xlane.f32.xlu0 %v225_v27 }
 0x19e   :  { %229 = vadd.xlane.f32.xlu0 %v228_v29 }
 0x223   :  { %v227_v30 = vpop.xlane.xlu0 %226 }
 0x224   :  { %v232_v31 = vmul.f32 0.03125, %v227_v30 }
 0x226   :  { %v234_v32 = vsub.f32 %v223_v26, %v232_v31 }
 0x227   :  { %v230_v33 = vpop.xlane.xlu0 %229 }
 0x228   :  { %v233_v34 = vmul.f32 0.03125, %v230_v33  ;;  %v236_v35 = vmul.f32 %v234_v32, %v234_v32 }
 0x22a   :  { %v235_v36 = vsub.f32 %v224_v28, %v233_v34  ;;  %v238_v37 = vsel %vm43_vm0, %v236_v35, 0.0 }
 0x22b   :  { %239 = vadd.xlane.f32.xlu1 %v238_v37 }
 0x22c   :  { %v237_v38 = vmul.f32 %v235_v36, %v235_v36 }
 0x22e   :  { %v241_v39 = vsel %vm43_vm0, %v237_v38, 0.0 }
 0x22f   :  { %242 = vadd.xlane.f32.xlu1 %v241_v39 }
 0x2b4   :  { %v240_v40 = vpop.xlane.xlu1 %239 }
 0x2b5   :  { %v244_v41 = vmul.f32 0.03125, %v240_v40 }
 0x2b7   :  { %v246_v42 = vadd.f32 1e-05, %v244_v41 }
 0x2b8   :  { %v243_v43 = vpop.xlane.xlu1 %242 }
 0x2b9   :  { %343 = vrsqrt.f32 %v246_v42  ;;  %v245_v44 = vmul.f32 0.03125, %v243_v43 }
 0x2bb   :  { %v247_v45 = vadd.f32 1e-05, %v245_v44 }
 0x2bd   :  { %345 = vrsqrt.f32 %v247_v45 }
 0x2c6   :  { %v344_v46 = vpop.eup %343 }
 0x2c7   :  { %v250_v48 = vmul.f32 %v344_v46, %v234_v32 }
 0x2c9   :  { %v258_v50 = vmul.f32 %v292_v47, %v250_v48 }
 0x2ca   :  { %v346_v51 = vpop.eup %345 }
 0x2cb   :  { %v251_v52 = vmul.f32 %v346_v51, %v235_v36  ;;  %v266_v53 = vadd.f32 %v293_v49, %v258_v50 }
 0x2cd   :  { %v259_v54 = vmul.f32 %v292_v47, %v251_v52  ;;  %268 = vst.msk [vmem:[#allocation2] sm:$0xff] %vm43_vm0, %v266_v53 }
 0x2cf   :  { %v267_v55 = vadd.f32 %v293_v49, %v259_v54 }
 0x2d1   :  { %269 = vst.msk [vmem:[#allocation2 + $0x8] sm:$0xff] %vm43_vm0, %v267_v55 }
 0x2d2   :  { %358 = shalt.err (!%p355_p4)
}
 0x2d3   :  { %s370_s5 = smov 128   ;;  %s371_s6 = smov 8  }
 0x2d4   :  { %281 = dma.vmem_to_hbm [thread:$0]  %s276_s10, 256, %s484_s7, [#allocation3], %s370_s5, %s370_s5, %s371_s6  }
 0x2d5   :  { %367 = dma.done.wait [#allocation3], 256  }
 0x2d6   :  { %368 = vsyncadd [#allocation3], 4294967040 }
 0x2d7   :  { %285 = vsyncpa [#allocation3], 1 }

</bundles_post_ra>
